<compile_context>
chip_gen: v6e
topology: v6e:2x2x1
jax: 0.10.0
libtpu: 0.0.40
codegen_flags: <defaults>
</compile_context>

<pallas_src>
import functools

import jax
import jax.numpy as jnp
from jax.experimental import pallas as pl
from jax.experimental.pallas import tpu as pltpu


def _round_up(x, m):
    return ((x + m - 1) // m) * m


def _mean_kernel(x_ref, o_ref, acc_ref, *, inv_l):
    # x_ref: (TR, TL) input chunk, o_ref: (TR, 1) output, acc_ref: (TR, 1) f32.
    k = pl.program_id(1)

    @pl.when(k == 0)
    def _():
        acc_ref[...] = jnp.zeros_like(acc_ref)

    x = x_ref[...].astype(jnp.float32)
    acc_ref[...] += jnp.sum(x, axis=-1, keepdims=True)

    @pl.when(k == pl.num_programs(1) - 1)
    def _():
        o_ref[...] = (acc_ref[...] * inv_l).astype(o_ref.dtype)


def _vmem_capacity_bytes():
    try:
        return pltpu.get_tpu_info().vmem_capacity_bytes
    except Exception:
        return 64 * 1024 * 1024  # conservative (v7x-class)


def adaptive_avg_pool3d(x):
    """x: (N, C, D, H, W) -> (N, C, 1, 1, 1), mean over (D, H, W)."""
    N, C, D, H, W = x.shape
    rows = N * C
    L = D * H * W
    x2 = x.reshape(rows, L)
    itemsize = x.dtype.itemsize

    # Packed-sublane granularity for the row (second-to-last) block dim.
    if itemsize >= 4:
        sub = 8
    elif itemsize == 2:
        sub = 16
    else:
        sub = 32

    # ---- tile sizing (HBM-bandwidth bound: big, lane-dense input blocks) ----
    TL_CAP = 4096  # reduce-axis chunk (multiple of 128)
    tile_l = min(_round_up(L, 128), TL_CAP)

    vmem_cap = _vmem_capacity_bytes()
    # Target input block: 8 MiB on 128 MiB-VMEM chips (v5e/v6e), 4 MiB on 64 MiB (v7x).
    block_budget = (8 if vmem_cap >= 100 * 1024 * 1024 else 4) * 1024 * 1024

    tile_rows = max(sub, (block_budget // (tile_l * itemsize)) // sub * sub)
    tile_rows = min(tile_rows, _round_up(rows, sub))
    # Prefer >=2 row grid steps so v7x's second TensorCore gets used.
    if rows > 2 * sub and tile_rows >= _round_up(rows, sub):
        tile_rows = max(sub, _round_up(pl.cdiv(rows, 2), sub))

    # ---- wrapper-side zero padding (exact: divide by the true L below) ----
    rows_pad = _round_up(rows, tile_rows)
    l_pad = _round_up(L, tile_l)
    if (rows_pad, l_pad) != (rows, L):
        x2 = jnp.pad(x2, ((0, rows_pad - rows), (0, l_pad - L)))

    grid = (rows_pad // tile_rows, l_pad // tile_l)

    in_block_bytes = tile_rows * tile_l * itemsize
    vmem_limit = 2 * in_block_bytes + 8 * tile_rows * 4 + (4 << 20)

    cost = pl.CostEstimate(
        flops=rows_pad * l_pad,
        transcendentals=0,
        bytes_accessed=rows_pad * l_pad * itemsize + rows_pad * itemsize,
    )

    out = pl.pallas_call(
        functools.partial(_mean_kernel, inv_l=1.0 / float(L)),
        out_shape=jax.ShapeDtypeStruct((rows_pad, 1), x.dtype),
        grid_spec=pltpu.PrefetchScalarGridSpec(
            num_scalar_prefetch=0,
            grid=grid,
            in_specs=[pl.BlockSpec((tile_rows, tile_l), lambda i, k: (i, k))],
            out_specs=pl.BlockSpec((tile_rows, 1), lambda i, k: (i, 0)),
            scratch_shapes=[pltpu.VMEM((tile_rows, 1), jnp.float32)],
        ),
        compiler_params=pltpu.CompilerParams(
            dimension_semantics=("parallel", "arbitrary"),
            vmem_limit_bytes=int(vmem_limit),
        ),
        cost_estimate=cost,
    )(x2)

    return out[:rows].reshape(N, C, 1, 1, 1)


def _check(x, atol, rtol):
    y = jax.block_until_ready(adaptive_avg_pool3d(x))
    y_ref = jnp.mean(x.astype(jnp.float32), axis=(-3, -2, -1), keepdims=True).astype(x.dtype)
    assert y.shape == x.shape[:2] + (1, 1, 1), y.shape
    assert y.dtype == x.dtype
    assert jnp.allclose(y.astype(jnp.float32), y_ref.astype(jnp.float32),
                        atol=atol, rtol=rtol), (y.ravel(), y_ref.ravel())


if __name__ == "__main__":
    key = jax.random.PRNGKey(0)
    k0, k1, k2 = jax.random.split(key, 3)

    # 1) aligned shape, f32
    x0 = jax.random.normal(k0, (2, 4, 4, 8, 8), dtype=jnp.float32)
    _check(x0, atol=1e-5, rtol=1e-5)

    # 2) ragged shape (D*H*W = 147, rows = 6), f32 -> exercises zero padding
    x1 = jax.random.normal(k1, (2, 3, 3, 7, 7), dtype=jnp.float32)
    _check(x1, atol=1e-5, rtol=1e-5)

    # 3) ragged shape, bf16 -> packed-sublane tiling, f32 accumulation
    x2 = jax.random.normal(k2, (2, 4, 3, 7, 7), dtype=jnp.bfloat16)
    _check(x2, atol=1e-2, rtol=1e-2)

    print("KERNEL_OK")
</pallas_src>

<mosaic_0001>
module attributes {stable_mosaic.version = 11 : i64} {
  func.func @_mean_kernel(%arg0: i32, %arg1: i32, %arg2: memref<8x256xf32, #tpu.memory_space<vmem>>, %arg3: memref<8x1xf32, #tpu.memory_space<vmem>>, %arg4: memref<8x1xf32, #tpu.memory_space<vmem>>) attributes {dimension_semantics = [#tpu.dimension_semantics<parallel>, #tpu.dimension_semantics<arbitrary>], iteration_bounds = array<i64: 1, 1>, scalar_prefetch = 0 : i64, scratch_operands = 1 : i64, tpu.core_type = #tpu.core_type<tc>, window_params = [{transform_indices = @transform_0, window_bounds = array<i64: 8, 256>}, {transform_indices = @transform_1, window_bounds = array<i64: 8, 1>}]} {
    %c0_i32 = arith.constant 0 : i32
    %0 = arith.cmpi eq, %arg1, %c0_i32 : i32
    %1 = arith.extui %0 : i1 to i32
    %c0_i32_0 = arith.constant 0 : i32
    %2 = arith.cmpi ne, %1, %c0_i32_0 : i32
    scf.if %2 {
      %cst_8 = arith.constant 0.000000e+00 : f32
      %12 = vector.broadcast %cst_8 : f32 to vector<8x1xf32>
      %c0_9 = arith.constant 0 : index
      %c0_10 = arith.constant 0 : index
      %13 = vector.load %arg4[%c0_9, %c0_10] : memref<8x1xf32, #tpu.memory_space<vmem>>, vector<8x1xf32>
      tpu.vector_store %arg4[%c0_9, %c0_10], %12 {strides = array<i32>} : memref<8x1xf32, #tpu.memory_space<vmem>>, vector<8x1xf32>,
    } else {
    }
    %c0 = arith.constant 0 : index
    %c0_1 = arith.constant 0 : index
    %3 = vector.load %arg2[%c0, %c0_1] : memref<8x256xf32, #tpu.memory_space<vmem>>, vector<8x256xf32>
    %c0_2 = arith.constant 0 : index
    %c0_3 = arith.constant 0 : index
    %4 = vector.load %arg4[%c0_2, %c0_3] : memref<8x1xf32, #tpu.memory_space<vmem>>, vector<8x1xf32>
    %cst = arith.constant dense<0.000000e+00> : vector<8xf32>
    %5 = vector.multi_reduction <add>, %3, %cst [1] : vector<8x256xf32> to vector<8xf32>
    %6 = vector.shape_cast %5 : vector<8xf32> to vector<8x1xf32>
    %7 = arith.addf %4, %6 : vector<8x1xf32>
    %c0_4 = arith.constant 0 : index
    %c0_5 = arith.constant 0 : index
    %8 = vector.load %arg4[%c0_4, %c0_5] : memref<8x1xf32, #tpu.memory_space<vmem>>, vector<8x1xf32>
    tpu.vector_store %arg4[%c0_4, %c0_5], %7 {strides = array<i32>} : memref<8x1xf32, #tpu.memory_space<vmem>>, vector<8x1xf32>,
    %c0_i32_6 = arith.constant 0 : i32
    %9 = arith.cmpi eq, %arg1, %c0_i32_6 : i32
    %10 = arith.extui %9 : i1 to i32
    %c0_i32_7 = arith.constant 0 : i32
    %11 = arith.cmpi ne, %10, %c0_i32_7 : i32
    scf.if %11 {
      %c0_8 = arith.constant 0 : index
      %c0_9 = arith.constant 0 : index
      %12 = vector.load %arg4[%c0_8, %c0_9] : memref<8x1xf32, #tpu.memory_space<vmem>>, vector<8x1xf32>
      %cst_10 = arith.constant 3.906250e-03 : f32
      %13 = vector.broadcast %cst_10 : f32 to vector<8x1xf32>
      %14 = arith.mulf %12, %13 : vector<8x1xf32>
      %c0_11 = arith.constant 0 : index
      %c0_12 = arith.constant 0 : index
      %15 = vector.load %arg3[%c0_11, %c0_12] : memref<8x1xf32, #tpu.memory_space<vmem>>, vector<8x1xf32>
      tpu.vector_store %arg3[%c0_11, %c0_12], %14 {strides = array<i32>} : memref<8x1xf32, #tpu.memory_space<vmem>>, vector<8x1xf32>,
    } else {
    }
    return
  }
  func.func @transform_0(%arg0: i32, %arg1: i32) -> (i32, i32) {
    %c0_i32 = arith.constant 0 : i32
    return %arg0, %arg1 : i32, i32
  }
  func.func @transform_1(%arg0: i32, %arg1: i32) -> (i32, i32) {
    %c0_i32 = arith.constant 0 : i32
    %c0_i32_0 = arith.constant 0 : i32
    return %arg0, %c0_i32 : i32, i32
  }
}

</mosaic_0001>

<bundles_post_ra>
// kernel: tpu_custom_call.1
= control target key start
LH: loop header
LB: loop body
LE: loop exit
PB: predicated region body
PF: predicated region fallthrough
CT: control target
= control target key end

     0   :  { %6 = vsyncpa [#allocation4], 0  ;;  %s70_s6 = smov [#allocation3]   ;;  %s88_s0 = inlined_call_operand.hbm [shape: f32[8,256], index: 0, kind: input, shape index: {}]   ;;  %s89_s1 = inlined_call_operand.vmem [shape: f32[8,1], index: 1, kind: output, shape index: {}]  }
   0x1   :  { %s13_s7 = sshll.u32 %s70_s6, 4  ;;  %s14_s7 = int_to_ptr.vmem [resolvable:$true] %s13_s7 }
   0x2   :  { %s56_s8 = scalar_lea.vmem %s14_s7, 256  ;;  %p61_p1 = scmp.lt.s32.totalorder %s14_s7, %s14_s7 }
   0x3   :  { %p57_p0 = scmp.ne.s32.totalorder %s14_s7, %s56_s8  ;;  %p62_p2 = scmp.lt.s32.totalorder %s56_s8, %s56_s8 }
   0x5   :  { %p63_p3 = por %p62_p2, %p61_p1 }
   0x7   :  { %p64_p4 = pnand %p63_p3, %p57_p0 }
   0x9   :  { %67 = shalt.err (!%p64_p4)
}
   0xa   :  { %16 = dma.hbm_to_vmem [thread:$0]  %s88_s0, 256, %s14_s7, [#allocation4]  }
   0xb   :  { %68 = dma.done.wait [#allocation4], 256  }
   0xc   :  { %69 = vsyncadd [#allocation4], 4294967040  ;;  %vm24_vm0 = vcmask 7168   ;;  %v71_v0 = vmov 0.0   ;;  %v26_v1 = vld [vmem:[#allocation3] sm:$0xff]  ;;  %v27_v2 = vld [vmem:[#allocation3 + $0x8] sm:$0xff] }
   0xd   :  { %25 = vst.msk [vmem:[#allocation2] sm:$0xff] %vm24_vm0, %v71_v0  ;;  %v29_v3 = vadd.f32 %v27_v2, %v26_v1 }
   0xf   :  { %30 = vadd.xlane.f32.xlu0 %v29_v3 }
  0x14   :  { %v28_v4 = vld [vmem:[#allocation2] sm:$0xff] }
  0x98   :  { %v31_v5 = vpop.xlane.xlu0 %30 }
  0x99   :  { %v32_v6 = vadd.f32 %v31_v5, %v28_v4 }
  0x9b   :  { %34 = vst.msk [vmem:[#allocation2] sm:$0xff] %vm24_vm0, %v32_v6 }
  0xa2   :  { %v38_v7 = vld [vmem:[#allocation2] sm:$0xff] }
  0xa3   :  { %v39_v8 = vmul.f32 0.00390625, %v38_v7 }
  0xa5   :  { %40 = vst.msk [vmem:[%s89_s1] sm:$0xff] %vm24_vm0, %v39_v8 }
  0xa6   :  { %45 = vsyncpa [#allocation4], 1 }

</bundles_post_ra>
